<compile_context>
chip_gen: v6e
topology: v6e:2x2x1
jax: 0.10.0
libtpu: 0.0.40
codegen_flags: <defaults>
</compile_context>

<pallas_src>
import functools

import jax
import jax.numpy as jnp
from jax import lax
from jax.experimental import pallas as pl
from jax.experimental.pallas import tpu as pltpu

BN_EPS = 1e-5
PRELU_ALPHA = 0.25   # nn.PReLU() default init (single shared parameter)
LRELU_ALPHA = 0.01   # nn.LeakyReLU() default
# TODO(synk): PReLU alpha is learnable in PyTorch; trained checkpoints must pass
#             the real alpha via the `alpha=` argument.


def _apply_act(y, act, alpha):
    if act is None or act == "none":
        return y
    if act in ("prelu", "lrelu"):
        return jnp.where(y >= 0.0, y, alpha * y)
    if act == "relu":
        return jnp.maximum(y, 0.0)
    if act == "tanh":
        return jnp.tanh(y)
    raise ValueError(f"unsupported activation: {act!r}")


# ---------------------------------------------------------------------------
# Pallas kernel: fused conv2d ('same' padding, stride 1) + folded-BN bias +
# activation for one (batch, row-tile) grid step.
#
#   x_ref : (Cin, Lin)         bf16  flat padded row tile (halo + KW-1 extra zero cols)
#   w_ref : (Cout, KH*KW*Cin)  bf16  BN-folded weights, K ordered (kh, kw, cin)
#   b_ref : (Cout, 1)          f32   BN-folded bias
#   o_ref : (Cout, M)                M = TH*Wp output slab (pad columns included,
#                                    stripped wrapper-side with one XLA slice)
# ---------------------------------------------------------------------------
def _conv_bn_act_kernel(x_ref, w_ref, b_ref, o_ref, *, KH, KW, Wp, M, act, alpha):
    # In-kernel im2col: K = KH*KW*Cin shifted flat views, sliced directly in
    # bf16 (no cast round trip), stacked along the contraction dim.
    pieces = []
    for kh in range(KH):
        for kw in range(KW):
            off = kh * Wp + kw
            pieces.append(x_ref[:, off:off + M])
    patches = pieces[0] if len(pieces) == 1 else jnp.concatenate(pieces, axis=0)  # (K, M)

    # Single deep-K MXU matmul; all TH*Wp spatial positions on the lane (N) dim.
    acc = jnp.dot(w_ref[...], patches, preferred_element_type=jnp.float32)        # (Cout, M)

    # f32 epilogue over the full slab (garbage pad columns are stripped wrapper-side).
    out = acc + b_ref[...]
    out = _apply_act(out, act, alpha)
    o_ref[...] = out.astype(o_ref.dtype)


# ---------------------------------------------------------------------------
# VMEM budgeting + row-tile selection.
# ---------------------------------------------------------------------------
def _vmem_capacity_bytes():
    try:
        return int(pltpu.get_tpu_info().vmem_capacity_bytes)
    except Exception:
        return 64 << 20   # conservative default (v7x per-TensorCore VMEM)


def _step_vmem_bytes(Cin, Cout, K, TH, KH, KW, Wp, out_bytes):
    """Per-grid-step VMEM: double-buffered blocks + in-kernel intermediates."""
    th_in = TH + KH - 1
    lin = th_in * Wp + (KW - 1)
    m = TH * Wp
    dbuf = 2 * (Cin * lin * 2 + Cout * m * out_bytes) + 2 * (Cout * K * 2 + Cout * 4)
    interm = K * m * 2 + 2 * Cout * m * 4     # patches (bf16) + acc + epilogue temp (f32)
    return dbuf + interm


def _pick_row_tile(H, Wp, KH, KW, Cin, Cout, K, N, out_bytes, budget, requested=None):
    if requested is not None:
        if H % requested != 0:
            raise ValueError(f"row_tile={requested} must divide H={H}")
        return requested

    def est(th):
        return _step_vmem_bytes(Cin, Cout, K, th, KH, KW, Wp, out_bytes)

    cands = [th for th in range(1, H + 1) if H % th == 0]
    fitting = [th for th in cands if est(th) <= budget] or [min(cands)]

    def key(th):
        m = th * Wp
        align = 2 if m % 256 == 0 else (1 if m % 128 == 0 else 0)   # v6e/v7x MXU: prefer 256
        enough_steps = 1 if N * (H // th) >= 2 else 0               # keep both v7x TCs busy
        return (enough_steps, align, th)                            # then biggest fitting tile

    return max(fitting, key=key)


# ---------------------------------------------------------------------------
# Wrapper: Conv2d(k, stride=1, padding=k//2) [+ BatchNorm2d (eval)] [+ act].
# ---------------------------------------------------------------------------
def conv_block(x, weight, bias, *, bn=False, bn_stats=None, act=None, alpha=None,
               stride=1, row_tile=None, out_dtype=None):
    """x: (N, Cin, H, W) NCHW; weight: (Cout, Cin, KH, KW) OIHW; bias: (Cout,)."""
    # TODO(synk): stride > 1 not implemented (SRGAN generator uses stride=1).
    assert stride == 1
    N, Cin, H, W = x.shape
    Cout, Cin_w, KH, KW = weight.shape
    assert Cin_w == Cin and KH == KW and KH % 2 == 1, \
        "square odd kernels only (padding = kernel_size // 2)"
    if alpha is None:
        alpha = PRELU_ALPHA if act == "prelu" else LRELU_ALPHA
    if out_dtype is None:
        out_dtype = x.dtype

    ph, pw = KH // 2, KW // 2
    K = KH * KW * Cin

    # Fold eval-mode BatchNorm into the conv weights / bias.
    # TODO(synk): training-mode batch statistics are not reproduced.
    if bn:
        if bn_stats is None:   # fresh nn.BatchNorm2d: gamma=1, beta=0, mean=0, var=1
            gamma = jnp.ones((Cout,), jnp.float32)
            beta = jnp.zeros((Cout,), jnp.float32)
            mean = jnp.zeros((Cout,), jnp.float32)
            var = jnp.ones((Cout,), jnp.float32)
        else:
            gamma, beta, mean, var = bn_stats
        scale = gamma / jnp.sqrt(var + BN_EPS)
        shift = beta - mean * scale
    else:
        scale = jnp.ones((Cout,), jnp.float32)
        shift = jnp.zeros((Cout,), jnp.float32)

    # (Cout, Cin, KH, KW) -> (Cout, KH*KW*Cin), K ordered (kh, kw, cin) to match
    # the in-kernel im2col; BN scale folded per output channel.
    w2 = (weight.astype(jnp.float32) * scale[:, None, None, None]).transpose(0, 2, 3, 1)
    w2 = w2.reshape(Cout, K).astype(jnp.bfloat16)
    b2 = (bias.astype(jnp.float32) * scale + shift).reshape(Cout, 1)

    # Padded width; round up to a multiple of 128 when the waste is small so the
    # kh*Wp tap offsets land on vreg boundaries (only the kw shifts need XLU).
    Wp0 = W + 2 * pw
    Wp128 = ((Wp0 + 127) // 128) * 128
    Wp = Wp128 if (Wp128 - Wp0) * 4 <= Wp0 else Wp0

    out_bytes = jnp.dtype(out_dtype).itemsize
    cap = _vmem_capacity_bytes()
    budget = min(cap // 2, 96 << 20)
    TH = _pick_row_tile(H, Wp, KH, KW, Cin, Cout, K, N, out_bytes, budget, row_tile)
    nH = H // TH
    TH_in = TH + KH - 1
    M = TH * Wp                       # output slab width per step (pad cols included)
    Lin = TH_in * Wp + (KW - 1)       # flat input length needed for all taps

    # Stage padded / haloed row tiles (pad + slice + cast fuse into one XLA copy
    # under jit; nH == 1 needs no halo duplication at all).
    # TODO(synk): manual-DMA halo windows (memory_space=pl.ANY) would avoid the
    #             halo duplication entirely for very large images.
    x_pad = jnp.pad(x, ((0, 0), (0, 0), (ph, ph), (pw, Wp - W - pw)))
    if nH == 1:
        flat = x_pad.reshape(N, 1, Cin, TH_in * Wp)
    else:
        flat = jnp.stack(
            [x_pad[:, :, t * TH: t * TH + TH_in, :] for t in range(nH)], axis=1)
        flat = flat.reshape(N, nH, Cin, TH_in * Wp)
    if KW > 1:
        flat = jnp.pad(flat, ((0, 0), (0, 0), (0, 0), (0, KW - 1)))
    x_tiles = flat.astype(jnp.bfloat16)

    kernel = functools.partial(_conv_bn_act_kernel, KH=KH, KW=KW, Wp=Wp, M=M,
                               act=act, alpha=alpha)

    est = _step_vmem_bytes(Cin, Cout, K, TH, KH, KW, Wp, out_bytes)
    vmem_limit = int(min(max(32 << 20, 2 * est + (8 << 20)), int(0.75 * cap)))

    out = pl.pallas_call(
        kernel,
        out_shape=jax.ShapeDtypeStruct((N, nH, Cout, M), out_dtype),
        grid=(N, nH),
        in_specs=[
            pl.BlockSpec((None, None, Cin, Lin), lambda n, t: (n, t, 0, 0)),
            pl.BlockSpec((Cout, K), lambda n, t: (0, 0)),   # resident weights
            pl.BlockSpec((Cout, 1), lambda n, t: (0, 0)),   # resident bias
        ],
        out_specs=pl.BlockSpec((None, None, Cout, M), lambda n, t: (n, t, 0, 0)),
        compiler_params=pltpu.CompilerParams(
            dimension_semantics=("parallel", "parallel"),
            vmem_limit_bytes=vmem_limit),
    )(x_tiles, w2, b2)

    # (N, nH, Cout, TH*Wp) -> (N, Cout, H, Wp) -> strip the pad columns (one
    # cheap XLA slice; fuses into the next block's staging copy under jit).
    out = out.transpose(0, 2, 1, 3).reshape(N, Cout, H, Wp)
    return out[:, :, :, :W]


# ---------------------------------------------------------------------------
# Parameter init (matches _conv.__init__) and a pure-JAX reference.
# ---------------------------------------------------------------------------
def init_conv_params(key, cin, cout, k):
    w = jax.random.normal(key, (cout, cin, k, k), jnp.float32) * 0.02  # OIHW
    b = jnp.zeros((cout,), jnp.float32)
    return w, b


def reference_conv_block(x, weight, bias, *, bn=False, bn_stats=None,
                         act=None, alpha=None):
    if alpha is None:
        alpha = PRELU_ALPHA if act == "prelu" else LRELU_ALPHA
    x = x.astype(jnp.float32)
    y = lax.conv_general_dilated(
        x, weight, window_strides=(1, 1), padding="SAME",
        dimension_numbers=("NCHW", "OIHW", "NCHW"),
        precision=lax.Precision.HIGHEST)
    y = y + bias[None, :, None, None]
    if bn:
        if bn_stats is None:
            gamma = jnp.ones_like(bias); beta = jnp.zeros_like(bias)
            mean = jnp.zeros_like(bias); var = jnp.ones_like(bias)
        else:
            gamma, beta, mean, var = bn_stats
        y = ((y - mean[None, :, None, None])
             * (gamma / jnp.sqrt(var + BN_EPS))[None, :, None, None]
             + beta[None, :, None, None])
    return _apply_act(y, act, alpha)


if __name__ == "__main__":
    key = jax.random.PRNGKey(0)
    k_x, k_w1, k_bn, k_w2 = jax.random.split(key, 4)

    N, C_IN, H, W = 2, 4, 16, 16
    x = jax.random.normal(k_x, (N, C_IN, H, W), jnp.float32)

    # block 1: conv(k=3, 4->32) + BatchNorm (non-trivial eval stats) + PReLU.
    # row_tile=8 exercises the multi-tile halo path; bf16 inter-block output.
    C1 = 32
    w1, b1 = init_conv_params(k_w1, C_IN, C1, 3)
    kb1, kb2, kb3, kb4 = jax.random.split(k_bn, 4)
    bn_stats = (1.0 + 0.1 * jax.random.normal(kb1, (C1,), jnp.float32),
                0.1 * jax.random.normal(kb2, (C1,), jnp.float32),
                0.1 * jax.random.normal(kb3, (C1,), jnp.float32),
                jax.random.uniform(kb4, (C1,), jnp.float32, 0.5, 1.5))
    y1 = conv_block(x, w1, b1, bn=True, bn_stats=bn_stats, act="prelu",
                    row_tile=8, out_dtype=jnp.bfloat16)
    r1 = reference_conv_block(x, w1, b1, bn=True, bn_stats=bn_stats, act="prelu")

    # block 2: conv(k=3, 32->3) + Tanh, no BN, auto tile (single-tile path), f32 out.
    C2 = 3
    w2, b2 = init_conv_params(k_w2, C1, C2, 3)
    y2 = conv_block(y1, w2, b2, act="tanh", out_dtype=jnp.float32)
    r2 = reference_conv_block(y1, w2, b2, act="tanh")

    y1, y2, r1, r2 = jax.block_until_ready((y1, y2, r1, r2))

    assert y1.shape == (N, C1, H, W) and y2.shape == (N, C2, H, W)
    y1f = y1.astype(jnp.float32)
    assert bool(jnp.all(jnp.isfinite(y1f))) and bool(jnp.all(jnp.isfinite(y2)))
    err1 = float(jnp.max(jnp.abs(y1f - r1)))
    err2 = float(jnp.max(jnp.abs(y2 - r2)))
    assert err1 < 5e-2 and err2 < 5e-2, (err1, err2)  # bf16-MXU / bf16-output tolerance
    print("KERNEL_OK")
</pallas_src>

<mosaic_0001>
module attributes {stable_mosaic.version = 11 : i64} {
  func.func @_conv_bn_act_kernel(%arg0: i32, %arg1: i32, %arg2: memref<1x1x4x182xbf16, #tpu.memory_space<vmem>>, %arg3: memref<32x36xbf16, #tpu.memory_space<vmem>>, %arg4: memref<32x1xf32, #tpu.memory_space<vmem>>, %arg5: memref<1x1x32x144xbf16, #tpu.memory_space<vmem>>) attributes {dimension_semantics = [#tpu.dimension_semantics<parallel>, #tpu.dimension_semantics<parallel>], iteration_bounds = array<i64: 2, 2>, scalar_prefetch = 0 : i64, scratch_operands = 0 : i64, tpu.core_type = #tpu.core_type<tc>, window_params = [{transform_indices = @transform_0, window_bounds = array<i64: 1, 1, 4, 182>}, {pipeline_mode = #tpu.pipeline_mode<synchronous>, transform_indices = @transform_1, window_bounds = array<i64: 32, 36>}, {pipeline_mode = #tpu.pipeline_mode<synchronous>, transform_indices = @transform_2, window_bounds = array<i64: 32, 1>}, {transform_indices = @transform_3, window_bounds = array<i64: 1, 1, 32, 144>}]} {
    %c0 = arith.constant 0 : index
    %c0_0 = arith.constant 0 : index
    %c0_1 = arith.constant 0 : index
    %c0_2 = arith.constant 0 : index
    %0 = vector.load %arg2[%c0, %c0_0, %c0_1, %c0_2] : memref<1x1x4x182xbf16, #tpu.memory_space<vmem>>, vector<1x1x4x144xbf16>
    %1 = vector.shape_cast %0 : vector<1x1x4x144xbf16> to vector<4x144xbf16>
    %c0_3 = arith.constant 0 : index
    %c0_4 = arith.constant 0 : index
    %c0_5 = arith.constant 0 : index
    %c1 = arith.constant 1 : index
    %2 = vector.load %arg2[%c0_3, %c0_4, %c0_5, %c1] : memref<1x1x4x182xbf16, #tpu.memory_space<vmem>>, vector<1x1x4x144xbf16>
    %3 = vector.shape_cast %2 : vector<1x1x4x144xbf16> to vector<4x144xbf16>
    %c0_6 = arith.constant 0 : index
    %c0_7 = arith.constant 0 : index
    %c0_8 = arith.constant 0 : index
    %c2 = arith.constant 2 : index
    %4 = vector.load %arg2[%c0_6, %c0_7, %c0_8, %c2] : memref<1x1x4x182xbf16, #tpu.memory_space<vmem>>, vector<1x1x4x144xbf16>
    %5 = vector.shape_cast %4 : vector<1x1x4x144xbf16> to vector<4x144xbf16>
    %c0_9 = arith.constant 0 : index
    %c0_10 = arith.constant 0 : index
    %c0_11 = arith.constant 0 : index
    %c18 = arith.constant 18 : index
    %6 = vector.load %arg2[%c0_9, %c0_10, %c0_11, %c18] : memref<1x1x4x182xbf16, #tpu.memory_space<vmem>>, vector<1x1x4x144xbf16>
    %7 = vector.shape_cast %6 : vector<1x1x4x144xbf16> to vector<4x144xbf16>
    %c0_12 = arith.constant 0 : index
    %c0_13 = arith.constant 0 : index
    %c0_14 = arith.constant 0 : index
    %c19 = arith.constant 19 : index
    %8 = vector.load %arg2[%c0_12, %c0_13, %c0_14, %c19] : memref<1x1x4x182xbf16, #tpu.memory_space<vmem>>, vector<1x1x4x144xbf16>
    %9 = vector.shape_cast %8 : vector<1x1x4x144xbf16> to vector<4x144xbf16>
    %c0_15 = arith.constant 0 : index
    %c0_16 = arith.constant 0 : index
    %c0_17 = arith.constant 0 : index
    %c20 = arith.constant 20 : index
    %10 = vector.load %arg2[%c0_15, %c0_16, %c0_17, %c20] : memref<1x1x4x182xbf16, #tpu.memory_space<vmem>>, vector<1x1x4x144xbf16>
    %11 = vector.shape_cast %10 : vector<1x1x4x144xbf16> to vector<4x144xbf16>
    %c0_18 = arith.constant 0 : index
    %c0_19 = arith.constant 0 : index
    %c0_20 = arith.constant 0 : index
    %c36 = arith.constant 36 : index
    %12 = vector.load %arg2[%c0_18, %c0_19, %c0_20, %c36] : memref<1x1x4x182xbf16, #tpu.memory_space<vmem>>, vector<1x1x4x144xbf16>
    %13 = vector.shape_cast %12 : vector<1x1x4x144xbf16> to vector<4x144xbf16>
    %c0_21 = arith.constant 0 : index
    %c0_22 = arith.constant 0 : index
    %c0_23 = arith.constant 0 : index
    %c37 = arith.constant 37 : index
    %14 = vector.load %arg2[%c0_21, %c0_22, %c0_23, %c37] : memref<1x1x4x182xbf16, #tpu.memory_space<vmem>>, vector<1x1x4x144xbf16>
    %15 = vector.shape_cast %14 : vector<1x1x4x144xbf16> to vector<4x144xbf16>
    %c0_24 = arith.constant 0 : index
    %c0_25 = arith.constant 0 : index
    %c0_26 = arith.constant 0 : index
    %c38 = arith.constant 38 : index
    %16 = vector.load %arg2[%c0_24, %c0_25, %c0_26, %c38] : memref<1x1x4x182xbf16, #tpu.memory_space<vmem>>, vector<1x1x4x144xbf16>
    %17 = vector.shape_cast %16 : vector<1x1x4x144xbf16> to vector<4x144xbf16>
    %18 = tpu.concatenate %1, %3, %5, %7, %9, %11, %13, %15, %17 in 0 : vector<4x144xbf16>, vector<4x144xbf16>, vector<4x144xbf16>, vector<4x144xbf16>, vector<4x144xbf16>, vector<4x144xbf16>, vector<4x144xbf16>, vector<4x144xbf16>, vector<4x144xbf16> -> vector<36x144xbf16>
    %c0_27 = arith.constant 0 : index
    %c0_28 = arith.constant 0 : index
    %19 = vector.load %arg3[%c0_27, %c0_28] : memref<32x36xbf16, #tpu.memory_space<vmem>>, vector<32x36xbf16>
    %cst = arith.constant dense<0.000000e+00> : vector<32x144xf32>
    %20 = tpu.matmul %19, %18, %cst {dimension_numbers = #tpu.dot_dimension_numbers<[1], [0], [0], [1], [0, 0, 1, 1], [], []>} : vector<32x36xbf16>, vector<36x144xbf16>, vector<32x144xf32> -> vector<32x144xf32>
    %c0_29 = arith.constant 0 : index
    %c0_30 = arith.constant 0 : index
    %21 = vector.load %arg4[%c0_29, %c0_30] : memref<32x1xf32, #tpu.memory_space<vmem>>, vector<32x1xf32>
    %22 = vector.broadcast %21 : vector<32x1xf32> to vector<32x144xf32>
    %23 = arith.addf %20, %22 : vector<32x144xf32>
    %cst_31 = arith.constant 0.000000e+00 : f32
    %24 = vector.broadcast %cst_31 : f32 to vector<32x144xf32>
    %25 = arith.cmpf oge, %23, %24 : vector<32x144xf32>
    %cst_32 = arith.constant 2.500000e-01 : f32
    %26 = vector.broadcast %cst_32 : f32 to vector<32x144xf32>
    %27 = arith.mulf %26, %23 : vector<32x144xf32>
    %28 = arith.select %25, %23, %27 : vector<32x144xi1>, vector<32x144xf32>
    %29 = arith.truncf %28 : vector<32x144xf32> to vector<32x144xbf16>
    %c0_33 = arith.constant 0 : index
    %c0_34 = arith.constant 0 : index
    %c0_35 = arith.constant 0 : index
    %c0_36 = arith.constant 0 : index
    %30 = vector.load %arg5[%c0_33, %c0_34, %c0_35, %c0_36] : memref<1x1x32x144xbf16, #tpu.memory_space<vmem>>, vector<1x1x32x144xbf16>
    %31 = vector.shape_cast %30 : vector<1x1x32x144xbf16> to vector<32x144xbf16>
    %32 = vector.shape_cast %29 : vector<32x144xbf16> to vector<1x1x32x144xbf16>
    tpu.vector_store %arg5[%c0_33, %c0_34, %c0_35, %c0_36], %32 {strides = array<i32>} : memref<1x1x32x144xbf16, #tpu.memory_space<vmem>>, vector<1x1x32x144xbf16>,
    return
  }
  func.func @transform_0(%arg0: i32, %arg1: i32) -> (i32, i32, i32, i32) {
    %c0_i32 = arith.constant 0 : i32
    %c0_i32_0 = arith.constant 0 : i32
    %c0_i32_1 = arith.constant 0 : i32
    return %arg0, %arg1, %c0_i32, %c0_i32_0 : i32, i32, i32, i32
  }
  func.func @transform_1(%arg0: i32, %arg1: i32) -> (i32, i32) {
    %c0_i32 = arith.constant 0 : i32
    %c0_i32_0 = arith.constant 0 : i32
    %c0_i32_1 = arith.constant 0 : i32
    return %c0_i32, %c0_i32_0 : i32, i32
  }
  func.func @transform_2(%arg0: i32, %arg1: i32) -> (i32, i32) {
    %c0_i32 = arith.constant 0 : i32
    %c0_i32_0 = arith.constant 0 : i32
    %c0_i32_1 = arith.constant 0 : i32
    return %c0_i32, %c0_i32_0 : i32, i32
  }
  func.func @transform_3(%arg0: i32, %arg1: i32) -> (i32, i32, i32, i32) {
    %c0_i32 = arith.constant 0 : i32
    %c0_i32_0 = arith.constant 0 : i32
    %c0_i32_1 = arith.constant 0 : i32
    return %arg0, %arg1, %c0_i32, %c0_i32_0 : i32, i32, i32, i32
  }
}

</mosaic_0001>

<bundles_post_ra>
// kernel: tpu_custom_call.1
= control target key start
LH: loop header
LB: loop body
LE: loop exit
PB: predicated region body
PF: predicated region fallthrough
CT: control target
= control target key end

     0   :  { %8 = vsyncpa [#allocation3], 0  ;;  %s1018_s0 = inlined_call_operand.vmem [shape: bf16[2,2,4,182], index: 0, kind: input, shape index: {}]   ;;  %s1019_s1 = inlined_call_operand.vmem [shape: bf16[32,36], index: 1, kind: input, shape index: {}]   ;;  %s1020_s2 = inlined_call_operand.vmem [shape: f32[32,1], index: 2, kind: input, shape index: {}]   ;;  %s1021_s3 = inlined_call_operand.hbm [shape: bf16[2,2,32,144], index: 3, kind: output, shape index: {}]  }
   0x1   :  { %10 = vsyncpa [#allocation3 + $0x1], 0  ;;  %s810_s12 = smov 0   ;;  %s812_s13 = smov 0  }
   0x2   :  { %s814_s14 = smov 0   ;;  %s816_s15 = smov 0  }
   0x3   :  { %s818_s16 = smov 0   ;;  %s820_s17 = smov 0  }
   0x4   :  { %s822_s18 = smov 0   ;;  %s824_s19 = smov 0  }
   0x5 LB: > { %s561_s20 = sadd.s32 4294967295, %s775_s19   ;;  %s562_s21 = sadd.s32 4294967294, %s775_s19   ;;  %s775_s19 = sphi %s824_s19, %s16_s19   ;;  %s771_s18 = sphi %s822_s18, %s1032_s18   ;;  %s767_s17 = sphi %s820_s17, %s1031_s17   ;;  %s763_s16 = sphi %s818_s16, %s1030_s16   ;;  %s759_s15 = sphi %s816_s15, %s1029_s15   ;;  %s755_s14 = sphi %s814_s14, %s1028_s14   ;;  %s751_s13 = sphi %s812_s13, %s1027_s13   ;;  %s747_s12 = sphi %s810_s12, %s1026_s12  }
   0x6   : > { %s25_s22 = sadd.s32 1, %s767_s17  ;;  %s28_s23 = sadd.s32 1, %s771_s18 }
   0x7   : > { %p26_p0 = scmp.ge.s32.totalorder %s25_s22, 2  ;;  %p117_p1 = scmp.ne.s32.totalorder %s755_s14, %s751_s13 }
   0x8   : > { %p118_p2 = scmp.eq.s32.totalorder %s561_s20, 3  ;;  %p123_p5 = scmp.ne.s32.totalorder %s751_s13, %s747_s12 }
   0x9   : > { %s1034_s22 = smov (%p26_p0, %s25_s22), 0  ;;  %s1036_s23 = smov (!%p26_p0, %s28_s23), %s771_s18 }
   0xa   : > { %s103_s24 = ssub.s32 %s767_s17, %s1034_s22  ;;  %p861_p3 = por %p118_p2, %p117_p1 }
   0xb   : > { %p30_p4 = scmp.ge.s32.totalorder %s1036_s23, 2  ;;  %p124_p6 = scmp.eq.s32.totalorder %s562_s21, 3 }
   0xc   : > { %p565_p7 = scmp.ge.s32.totalorder %s775_s19, 1  ;;  %p160_p9 = scmp.lt.s32.totalorder %s775_s19, 5 }
   0xd   : > { %s1038_s23 = smov (%p30_p4, %s1036_s23), 0  ;;  %p870_p8 = por %p124_p6, %p123_p5 }
   0xe   : > { %s102_s27 = ssub.s32 %s771_s18, %s1038_s23  ;;  %s107_s28 = sadd.s32 1, %s755_s14 }
   0xf   : > { %s104_s29 = sor.u32 %s103_s24, %s102_s27  ;;  %p161_p10 = pnand %p565_p7, %p160_p9 }
  0x10   : > { %p105_p11 = scmp.eq.s32.totalorder %s104_s29, 0  ;;  %p188_p12 = scmp.lt.s32.totalorder (!%p161_p10), %s763_s16, 1 }
  0x11   : > { %164 = sbr.rel (%p161_p10) target bundleno = 401 (0x191), region = 32  ;;  %p190_p13 = scmp.lt.s32.totalorder (!%p161_p10), %s759_s15, 1 }
  0x12   : > { %s879_s30 = scalar_select %p105_p11, %s755_s14, %s107_s28  }
  0x13   : > { %s778_s21 = smov (!%p161_p10), 109   ;;  %s779_s24 = smov (!%p161_p10), 90  }
  0x14   : > { %s780_s27 = smov (!%p161_p10), 92   ;;  %s781_s28 = smov (!%p161_p10), 108  }
  0x15   : > { %s782_s29 = smov (!%p161_p10), 91  }
  0x16   : > { %v203_v0 = vlaneseq  ;;  %v777_v1 = vmov 1983009808   ;;  %s189_s4 = scalar_select %p188_p12, %s763_s16, 1  ;;  %v783_v14 = vmov 0   ;;  %v307_v15 = vld [vmem:[%s1020_s2 + $0x8] sm:$0xff]  ;;  %v306_v16 = vld [vmem:[%s1020_s2] sm:$0xff] }
  0x17   : > { %v201_v2 = vunpack.c.l.s4 %v777_v1  ;;  %s191_s5 = scalar_select %p190_p13, %s759_s15, 1  ;;  %385 = vmatprep.mubr.bf16.mxu0 %v783_v14  ;;  %395 = vmatprep.mubr.bf16.mxu1 %v783_v14  ;;  %v308_v17 = vld [vmem:[%s1020_s2 + $0x10] sm:$0xff]  ;;  %v309_v18 = vld [vmem:[%s1020_s2 + $0x18] sm:$0xff]  ;;  %vm267_vm0 = vcmask 1041408   ;;  %vm265_vm1 = vcmask 736256   ;;  %vm241_vm2 = vcmask 891904  }
  0x18   : > { %v204_v3 = vshrl.u32 %v203_v0, 7  ;;  %s568_s6 = sshll.u32 %s189_s4, 2  ;;  %679 = vset.pattern.permute.xlu1 %v783_v14  ;;  %678 = vset.pattern.permute.xlu0 %v783_v14  ;;  %s784_s4 = smov 127   ;;  %vm247_vm3 = vcmask 883712   ;;  %vm253_vm4 = vcmask 752640   ;;  %vm274_vm5 = vcmask 1043456  }
  0x19   : > { %v202_v4 = vunpack.c.0.s8 %v201_v2  ;;  %s567_s7 = sshll.u32 %s191_s5, 1  ;;  %s785_s5 = smov 126   ;;  %vm259_vm6 = vcmask 744448   ;;  %vm279_vm7 = vcmask 1045504   ;;  %vm221_vm8 = vcmask 1039360   ;;  %v681_v56 = vld [vmem:[%s1019_s1] sm:$0xff]  }
  0x1a   : > { %s194_s8 = sadd.s32 %s568_s6, %s567_s7  ;;  %s786_s6 = smov 110   ;;  %vm228_vm9 = vcmask 1031168   ;;  %vm235_vm10 = vcmask 900096   ;;  %v682_v57 = vld [vmem:[%s1019_s1 + $0x8] sm:$0xff]   ;;  %vm340_vm11 = vcmask 293888   ;;  %vm454_vm14 = vcmask 130052  }
  0x1b   : > { %v205_v5 = vsub.s32 %v202_v4, %v204_v3  ;;  %s569_s9 = sshll.u32 %s194_s8, 1  ;;  %s581_s7 = sshll.u32 %s763_s16, 4 }
  0x1c   : > { %s196_s20 = scalar_lea.vmem %s1018_s0, %s569_s9 }
  0x1d   : > { %v198_v6 = vld [vmem:[%s196_s20] sm:$0xf] }
  0x1e   : > { %v888_v7 = vrot.slane %v198_v6, %v205_v5  ;;  %v208_v9 = vcombine.low %v198_v6, %v198_v6 }
  0x20   : > { %237 = vrot.lane.b32.xlu1 %v888_v7, %s778_s21  ;;  %261 = vrot.lane.b32.xlu0 %v888_v7, %s779_s24  ;;  %v894_v8 = vcombine.high %v888_v7, %v888_v7  ;;  %v215_v10 = vrot.slane %v208_v9, %v205_v5  ;;  %v223_v12 = vcombine.low %v888_v7, %v888_v7 }
  0x22   : > { %v216_v11 = vcombine.high %v215_v10, %v215_v10  ;;  %v230_v13 = vcombine.low %v215_v10, %v215_v10 }
  0x24   : > { %251 = vrot.lane.b32.xlu1 %v888_v7, %s780_s27  ;;  %263 = vrot.lane.b32.xlu0 %v894_v8, %s779_s24 }
  0x28   : > { %239 = vrot.lane.b32.xlu1 %v894_v8, %s778_s21  ;;  %243 = vrot.lane.b32.xlu0 %v215_v10, %s781_s28 }
  0x2c   : > { %245 = vrot.lane.b32.xlu1 %v216_v11, %s781_s28  ;;  %249 = vrot.lane.b32.xlu0 %v223_v12, %s780_s27  ;;  %s787_s28 = smov [#allocation2]  }
  0x30   : > { %257 = vrot.lane.b32.xlu1 %v215_v10, %s782_s29  ;;  %255 = vrot.lane.b32.xlu0 %v230_v13, %s782_s29  ;;  %s687_s29 = sshll.u32 %s787_s28, 4  ;;  %s688_s29 = int_to_ptr.vmem [resolvable:$false] %s687_s29 }
  0x34   : > { %219 = vrot.lane.b32.xlu1 %v216_v11, %s784_s4  ;;  %217 = vrot.lane.b32.xlu0 %v215_v10, %s784_s4  ;;  %s689_s4 = scalar_lea.vmem %s688_s29, 1024 }
  0x38   : > { %226 = vrot.lane.b32.xlu1 %v888_v7, %s785_s5  ;;  %224 = vrot.lane.b32.xlu0 %v223_v12, %s785_s5  ;;  %s185_s5 = sand.u32 1, %s751_s13  }
  0x39   : > { %s566_s8 = sshll.u32 %s185_s5, 5  ;;  %s967_s24 = scalar_lea.sflag [#allocation3], %s185_s5 }
  0x3a   : > { %s187_s16 = scalar_lea.vmem [#allocation2], %s566_s8 }
  0x3b   : > { %s476_s10 = sshll.u32 %s187_s16, 4  ;;  %s959_s10 = int_to_ptr.vmem [resolvable:$true] %s476_s10 }
  0x3c   : > { %233 = vrot.lane.b32.xlu1 %v215_v10, %s786_s6  ;;  %231 = vrot.lane.b32.xlu0 %v230_v13, %s786_s6  ;;  %s580_s6 = sshll.u32 %s759_s15, 3  ;;  %s683_s27 = scalar_lea.vmem %s959_s10, 512 }
  0x3d   : > { %s473_s9 = sadd.s32 %s581_s7, %s580_s6  ;;  %p684_p0 = scmp.ne.s32.totalorder %s959_s10, %s683_s27 }
  0x3e   : > { %s582_s15 = sshll.u32 %s473_s9, 6  ;;  %p690_p4 = scmp.lt.s32.totalorder %s959_s10, %s688_s29 }
  0x3f   : > { %s957_s21 = scalar_lea.hbm %s1021_s3, %s582_s15  ;;  %p685_p1 = pnand %p684_p0, %p861_p3 }
  0x40   : > { %317 = vperm.xlu1 %679, %v307_v15   ;;  %312 = vperm.xlu0 %678, %v306_v16   ;;  %p691_p5 = scmp.lt.s32.totalorder %s689_s4, %s683_s27 }
  0x41   : > { %p686_p2 = pneg %p685_p1 }
  0x42   : > { %p692_p6 = por %p691_p5, %p690_p4 }
  0x44   : > { %322 = vperm.xlu1 %679, %v308_v17   ;;  %327 = vperm.xlu0 %678, %v309_v18   ;;  %p693_p7 = pnand %p692_p6, %p686_p2 }
  0x92   : > { %v238_v19 = vpop.permute.xlu1 %237  ;;  %v262_v20 = vpop.permute.xlu0 %261 }
  0x96   : > { %v252_v21 = vpop.permute.xlu1 %251  ;;  %v264_v22 = vpop.permute.xlu0 %263 }
  0x97   : > { %572 = vmatprep.subr.msk.bf16.mxu0 %vm267_vm0, %v264_v22  ;;  %589 = vmatprep.subr.msk.bf16.mxu1 %vm267_vm0, %v264_v22  ;;  %v266_v23 = vsel %vm265_vm1, %v262_v20, %v264_v22  ;;  %vm946_vm1 = vmor %vm454_vm14, %vm274_vm5 }
  0x98   : > { %v348_v24 = vsel %vm267_vm0, %v266_v23, 0 }
  0x99   : > { %364 = vmatpush1.bf16.msra.mxu0 %v348_v24  ;;  %592 = vmatpush1.bf16.msra.mxu1 %v348_v24 }
  0x9a   : > { %v240_v25 = vpop.permute.xlu1 %239  ;;  %v244_v26 = vpop.permute.xlu0 %243 }
  0x9b   : > { %v242_v29 = vsel %vm241_vm2, %v238_v19, %v240_v25 }
  0x9e   : > { %v246_v27 = vpop.permute.xlu1 %245  ;;  %v250_v28 = vpop.permute.xlu0 %249 }
  0x9f   : > { %v248_v30 = vsel %vm247_vm3, %v244_v26, %v246_v27  ;;  %v291_v31 = vsel %vm267_vm0, %v240_v25, %v246_v27  ;;  %v254_v33 = vsel %vm253_vm4, %v250_v28, %v252_v21 }
  0xa0   : > { %v288_v32 = vsel %vm267_vm0, %v242_v29, %v248_v30  ;;  %v295_v36 = vsel %vm274_vm5, %v291_v31, %v252_v21 }
  0xa1   : > { %v293_v39 = vsel %vm274_vm5, %v288_v32, %v254_v33 }
  0xa2   : > { %v258_v34 = vpop.permute.xlu1 %257  ;;  %v256_v35 = vpop.permute.xlu0 %255 }
  0xa3   : > { %v260_v37 = vsel %vm259_vm6, %v256_v35, %v258_v34  ;;  %v300_v38 = vsel %vm279_vm7, %v295_v36, %v258_v34 }
  0xa4   : > { %365 = vmatprep.subr.bf16.mxu0 %v300_v38  ;;  %590 = vmatprep.subr.bf16.mxu1 %v300_v38  ;;  %v297_v40 = vsel %vm279_vm7, %v293_v39, %v260_v37 }
  0xa5   : > { %366 = vmatpush1.bf16.msra.mxu0 %v297_v40  ;;  %593 = vmatpush1.bf16.msra.mxu1 %v297_v40 }
  0xa6   : > { %v220_v41 = vpop.permute.xlu1 %219  ;;  %v218_v42 = vpop.permute.xlu0 %217 }
  0xa7   : > { %v222_v45 = vsel %vm221_vm8, %v218_v42, %v220_v41  ;;  %v273_v47 = vsel %vm267_vm0, %v894_v8, %v220_v41 }
  0xa8   : > { %v270_v48 = vsel %vm267_vm0, %v888_v7, %v222_v45 }
  0xaa   : > { %v227_v43 = vpop.permute.xlu1 %226  ;;  %v225_v44 = vpop.permute.xlu0 %224 }
  0xab   : > { %v229_v46 = vsel %vm228_vm9, %v225_v44, %v227_v43  ;;  %v278_v49 = vsel %vm274_vm5, %v273_v47, %v227_v43 }
  0xac   : > { %v276_v54 = vsel %vm274_vm5, %v270_v48, %v229_v46 }
  0xae   : > { %v234_v50 = vpop.permute.xlu1 %233  ;;  %v232_v51 = vpop.permute.xlu0 %231 }
  0xaf   : > { %v236_v52 = vsel %vm235_vm10, %v232_v51, %v234_v50  ;;  %v284_v53 = vsel %vm279_vm7, %v278_v49, %v234_v50 }
  0xb0   : > { %367 = vmatprep.subr.bf16.mxu0 %v284_v53  ;;  %591 = vmatprep.subr.bf16.mxu1 %v284_v53  ;;  %v281_v55 = vsel %vm279_vm7, %v276_v54, %v236_v52 }
  0xb1   : > { %368 = vmatpush1.bf16.msra.mxu0 %v281_v55  ;;  %594 = vmatpush1.bf16.msra.mxu1 %v281_v55 }
  0xb4   : > { %573 = vmatmul.mubr.msk.bf16.vlgmr.msra.gmra.mxu0 %vm340_vm11, %v681_v56  ;;  %574 = vmatmul.mubr.msk.bf16.vlgmr.msra.gmra.mxu1 %vm340_vm11, %v682_v57 }
  0xbb   : > { %v318_v58 = vpop.permute.xlu1 %317  ;;  %v313_v59 = vpop.permute.xlu0 %312 }
  0xbf   : > { %v323_v60 = vpop.permute.xlu1 %322  ;;  %v328_v5 = vpop.permute.xlu0 %327 }
 0x174   : > { %v387_v61 = vpop.f32.mrf.mxu0  ;;  %v397_v62 = vpop.f32.mrf.mxu1 }
 0x175   : > { %v388_v63 = vadd.f32 %v387_v61, %v313_v59  ;;  %v398_v0 = vadd.f32 %v397_v62, %v323_v60 }
 0x176   : > { %v389_v1 = vpop.f32.mrf.mxu0  ;;  %v399_v2 = vpop.f32.mrf.mxu1 }
 0x177   : > { %v414_v3 = vmul.f32 0.25, %v388_v63  ;;  %v418_v4 = vmul.f32 0.25, %v398_v0  ;;  %vm406_vm12 = vcmp.ge.f32.partialorder %v388_v63, 0.0  ;;  %vm410_vm13 = vcmp.ge.f32.partialorder %v398_v0, 0.0 }
 0x178   : > { %v390_v6 = vadd.f32 %v389_v1, %v313_v59  ;;  %v400_v7 = vadd.f32 %v399_v2, %v323_v60  ;;  %v391_v8 = vpop.f32.mrf.mxu0  ;;  %v401_v9 = vpop.f32.mrf.mxu1 }
 0x179   : > { %v392_v10 = vadd.f32 %v391_v8, %v318_v58  ;;  %v402_v11 = vadd.f32 %v401_v9, %v328_v5  ;;  %v422_v16 = vsel %vm406_vm12, %v388_v63, %v414_v3  ;;  %v426_v17 = vsel %vm410_vm13, %v398_v0, %v418_v4 }
 0x17a   : > { %vm407_vm15 = vcmp.ge.f32.partialorder %v390_v6, 0.0  ;;  %v415_v12 = vmul.f32 0.25, %v390_v6  ;;  %vm411_vm0 = vcmp.ge.f32.partialorder %v400_v7, 0.0  ;;  %v419_v13 = vmul.f32 0.25, %v400_v7  ;;  %v393_v14 = vpop.f32.mrf.mxu0  ;;  %v403_v15 = vpop.f32.mrf.mxu1 }
 0x17b   : > { %v416_v18 = vmul.f32 0.25, %v392_v10  ;;  %v420_v19 = vmul.f32 0.25, %v402_v11  ;;  %v394_v23 = vadd.f32 %v393_v14, %v318_v58  ;;  %v404_v24 = vadd.f32 %v403_v15, %v328_v5 }
 0x17c   : > { %v423_v20 = vsel %vm407_vm15, %v390_v6, %v415_v12  ;;  %v427_v22 = vsel %vm411_vm0, %v400_v7, %v419_v13  ;;  %vm408_vm2 = vcmp.ge.f32.partialorder %v392_v10, 0.0  ;;  %vm412_vm3 = vcmp.ge.f32.partialorder %v402_v11, 0.0 }
 0x17d   : > { %v585_v25 = vpack.c.bf16 %v423_v20, %v422_v16  ;;  %v587_v26 = vpack.c.bf16 %v427_v22, %v426_v17  ;;  %vm409_vm4 = vcmp.ge.f32.partialorder %v394_v23, 0.0  ;;  %v417_v27 = vmul.f32 0.25, %v394_v23 }
 0x17e   : > { %vm413_vm6 = vcmp.ge.f32.partialorder %v404_v24, 0.0  ;;  %v421_v28 = vmul.f32 0.25, %v404_v24  ;;  %v424_v29 = vsel %vm408_vm2, %v392_v10, %v416_v18  ;;  %v428_v30 = vsel %vm412_vm3, %v402_v11, %v420_v19 }
 0x17f   : > { %456 = vst.msk [vmem:[%s187_s16] sm:$0xff] %vm946_vm1, %v585_v25  ;;  %458 = vst.msk [vmem:[%s187_s16 + $0x10] sm:$0xff] %vm946_vm1, %v587_v26  ;;  %v425_v31 = vsel %vm409_vm4, %v394_v23, %v417_v27 }
 0x180   : > { %v429_v32 = vsel %vm413_vm6, %v404_v24, %v421_v28  ;;  %v586_v33 = vpack.c.bf16 %v425_v31, %v424_v29 }
 0x181   : > { %v588_v34 = vpack.c.bf16 %v429_v32, %v428_v30 }
 0x182   : > { %457 = vst.msk [vmem:[%s187_s16 + $0x8] sm:$0xff] %vm946_vm1, %v586_v33 }
 0x183   : > { %459 = vst.msk [vmem:[%s187_s16 + $0x18] sm:$0xff] %vm946_vm1, %v588_v34 }
 0x184   : > { %696 = shalt.err (!%p693_p7)
}
 0x185   : > { %s697_s5 = scalar_lea.hbm %s957_s21, 512  ;;  %s701_s8 = scalar_lea.hbm %s1021_s3, 2048 }
 0x186   : > { %p698_p9 = scmp.ne.s32.totalorder %s957_s21, %s697_s5  ;;  %p702_p12 = scmp.lt.s32.totalorder %s957_s21, %s1021_s3 }
 0x187   : > { %p703_p13 = scmp.lt.s32.totalorder %s701_s8, %s697_s5 }
 0x188   : > { %p699_p10 = pnand %p698_p9, %p861_p3 }
 0x189   : > { %p704_p0 = por %p703_p13, %p702_p12 }
 0x18a   : > { %p700_p11 = pneg %p699_p10 }
 0x18c   : > { %p705_p1 = pnand %p704_p0, %p700_p11 }
 0x18e   : > { %708 = shalt.err (!%p705_p1)
}
 0x18f   : > { %s788_s16 = smov 128   ;;  %s789_s11 = smov 8  }
 0x190   : > { %595 = dma.vmem_to_hbm [thread:$0]  (%p861_p3), %s959_s10, 512, %s957_s21, %s967_s24, %s788_s16, %s788_s16, %s789_s11  }
 0x191 PF: > { %p601_p2 = scmp.ge.s32.totalorder %s775_s19, 2  ;;  %s491_s20 = sand.u32 1, %s747_s12  }
 0x192   : > { %s492_s27 = scalar_lea.sflag [#allocation3], %s491_s20 }
 0x193   : > { %p598_p4 = pnand %p601_p2, %p870_p8 }
 0x195   : > { %p599_p5 = pneg %p598_p4 }
 0x197   : > { %742 = dma.done.wait (%p599_p5), %s492_s27, 512  }
 0x198   : > { %744 = vsyncadd (%p599_p5), %s492_s27, 4294966784  ;;  %s16_s19 = sadd.s32 1, %s775_s19   ;;  %s1026_s12 = smov %s751_s13 }
 0x199   : > { %p13_p6 = scmp.ge.s32.totalorder %s16_s19, 6   ;;  %s1027_s13 = smov %s755_s14 }
 0x19a   : > { %s1028_s14 = smov %s879_s30  ;;  %s1029_s15 = smov %s767_s17 }
 0x19b   : > { %s1030_s16 = smov %s771_s18  ;;  %s1031_s17 = smov %s1034_s22 }
 0x19c   : > { %s1032_s18 = smov %s1038_s23  ;;  %15 = sbr.rel (!%p13_p6) target bundleno = 5 (0x5), region = 67 }
 0x1a1   :  { %497 = vsyncpa [#allocation3], 1 }
 0x1a2   :  { %499 = vsyncpa [#allocation3 + $0x1], 1 }

</bundles_post_ra>
